<compile_context>
chip_gen: v7x
topology: tpu7x:2x2x1
jax: 0.10.0
libtpu: 0.0.40
codegen_flags: <defaults>
</compile_context>

<pallas_src>
import functools
import math

import jax
import jax.numpy as jnp
from jax.experimental import pallas as pl
from jax.experimental.pallas import tpu as pltpu


def _nt_dot(a, b):
    # (M, K) @ (H, K)^T -> (M, H); f32 accumulation on the MXU.
    return jax.lax.dot_general(
        a, b, (((1,), (1,)), ((), ())), preferred_element_type=jnp.float32
    )


def _timestep_mlp_kernel(t_ref, w1_ref, w2_ref, b_ref, o_ref, *, max_period):
    freq = w1_ref.shape[1]
    half = freq // 2

    # Sinusoidal embedding built directly as one (tm, freq) slab so Linear-1 is
    # a single K=freq contraction.  Columns [0, half) = cos(t * f[k]),
    # columns [half, freq) = sin(t * f[k - half]).
    col = jax.lax.broadcasted_iota(jnp.int32, (1, freq), 1)
    is_cos = col < half
    k = jnp.where(is_cos, col, col - half).astype(jnp.float32)
    freqs = jnp.exp(k * (-math.log(max_period) / half))              # (1, freq)
    args = t_ref[...] * freqs                                        # (tm, freq)
    emb = jnp.where(is_cos, jnp.cos(args), jnp.sin(args)).astype(jnp.bfloat16)

    # Linear 1: emb @ W1.T + b1  (one K=freq MXU push, no partial-sum add).
    h = _nt_dot(emb, w1_ref[...]) + b_ref[0:1, :]

    # SiLU(x) = x * sigmoid(x) -- exact sigmoid; the EUP slot has large slack
    # here so exactness is free.
    h = h / (1.0 + jnp.exp(-h))

    # Linear 2: h @ W2.T + b2
    out = _nt_dot(h.astype(jnp.bfloat16), w2_ref[...]) + b_ref[1:2, :]
    o_ref[...] = out.astype(o_ref.dtype)


def _resident_weight_spec(shape, single_buffer):
    # Weights use a constant index_map and stay VMEM-resident across the grid.
    # With >1 grid step they are never re-fetched, so one buffer is enough
    # (halves weight VMEM; matters for large hidden sizes on v7x's 64 MiB).
    if single_buffer:
        return pl.BlockSpec(shape, lambda i: (0, 0), pipeline_mode=pl.Buffered(1))
    return pl.BlockSpec(shape, lambda i: (0, 0))


def prepare_timestep_embedder_params(w1, b1, w2, b2):
    """One-time parameter prep (do NOT call per forward): bf16 weights kept in
    PyTorch (out_features, in_features) layout, biases stacked into one array."""
    return {
        "w1": w1.astype(jnp.bfloat16),                       # (H, F)
        "w2": w2.astype(jnp.bfloat16),                       # (H, H)
        "biases": jnp.stack([b1, b2]).astype(jnp.float32),   # (2, H)
    }


def parallel_timestep_embedder(t, params, frequency_embedding_size=256,
                               max_period=10000, out_dtype=jnp.float32):
    """t: (N,) float. params: output of prepare_timestep_embedder_params.

    out_dtype: pass jnp.bfloat16 when the consumer (adaLN/modulation) accepts it
    to halve the only per-row HBM writeback; default float32 matches PyTorch.
    """
    w1, w2, biases = params["w1"], params["w2"], params["biases"]
    hidden = w1.shape[0]
    freq = frequency_embedding_size
    assert freq % 2 == 0  # TODO(synk): odd-dim zero-pad branch of timestep_embedding unused here
    assert w1.shape == (hidden, freq) and w2.shape == (hidden, hidden)
    assert hidden % 128 == 0 and freq % 128 == 0, "expect lane-aligned feature dims"

    n = t.shape[0]
    t2 = t.astype(jnp.float32).reshape(n, 1)

    # N-aware tiling (perf review):
    #   * small N: one block, one TensorCore -- kernel is weight-DMA / launch
    #     bound, and megacore sharding would duplicate the W1/W2 fetch.
    #   * moderate N: two ~equal blocks so v7x's two TCs take one each.
    #   * large N: tm = 512 (sweep 256/512/1024 on 128-MiB-VMEM parts).
    if n <= 512:
        tm = n
    elif n <= 1024:
        tm = ((n + 1) // 2 + 7) // 8 * 8
    else:
        tm = 512
    num_blocks = pl.cdiv(n, tm)
    single_buffer_weights = num_blocks > 1
    # NOTE: when n % tm != 0, padded rows of the last block run cos/sin/exp on
    # garbage t values; rows are independent and the OOB output rows are masked,
    # so valid rows are unaffected (benign, but relevant if NaN-checking).

    kernel = functools.partial(_timestep_mlp_kernel, max_period=max_period)

    out_bytes = jnp.dtype(out_dtype).itemsize
    w_bytes = (w1.size + w2.size) * 2                      # bf16 weights
    # VMEM budget sized from the actual buffers (+ headroom) instead of the
    # chip-dependent scoped default (32 MiB on v6e/v7x, 16 MiB on v5e).
    vmem_bytes = (
        (1 if single_buffer_weights else 2) * w_bytes      # resident weights
        + 2 * biases.size * 4                              # biases (dbl-buffered)
        + 2 * tm * 4                                       # t tiles
        + 2 * tm * hidden * out_bytes                      # output tiles
        + tm * (3 * freq + 2 * hidden) * 4                 # kernel temporaries
    )
    vmem_limit = int(min(96 * 2**20, max(16 * 2**20, 2 * vmem_bytes)))

    cost = pl.CostEstimate(
        flops=2 * n * (freq * hidden + hidden * hidden),
        transcendentals=n * (freq + hidden) + num_blocks * freq,
        bytes_accessed=(w_bytes + biases.size * 4 + n * 4 + n * hidden * out_bytes),
    )

    # TODO(synk): if this embedder runs every denoising step with fixed weights,
    # pin W1/W2 in VMEM across calls (pltpu.with_memory_space_constraint or a
    # cross-call prefetch future) instead of re-DMAing them each invocation.
    return pl.pallas_call(
        kernel,
        out_shape=jax.ShapeDtypeStruct((n, hidden), out_dtype),
        grid=(num_blocks,),
        in_specs=[
            pl.BlockSpec((tm, 1), lambda i: (i, 0)),                         # t
            _resident_weight_spec((hidden, freq), single_buffer_weights),    # W1
            _resident_weight_spec((hidden, hidden), single_buffer_weights),  # W2
            pl.BlockSpec((2, hidden), lambda i: (0, 0)),                     # [b1; b2]
        ],
        out_specs=pl.BlockSpec((tm, hidden), lambda i: (i, 0)),
        compiler_params=pltpu.CompilerParams(
            dimension_semantics=("parallel",),
            vmem_limit_bytes=vmem_limit,
        ),
        cost_estimate=cost,
    )(t2, w1, w2, biases)


def _reference(t, w1, b1, w2, b2, frequency_embedding_size=256, max_period=10000):
    half = frequency_embedding_size // 2
    freqs = jnp.exp(-math.log(max_period) * jnp.arange(half, dtype=jnp.float32) / half)
    args = t.astype(jnp.float32)[:, None] * freqs[None, :]
    emb = jnp.concatenate([jnp.cos(args), jnp.sin(args)], axis=-1)
    h = emb @ w1.T + b1
    h = h * jax.nn.sigmoid(h)
    return h @ w2.T + b2


if __name__ == "__main__":
    key = jax.random.PRNGKey(0)
    k_t, k_w1, k_w2 = jax.random.split(key, 3)

    N = 8
    FREQ = 256
    HIDDEN = 128

    # deterministic synthetic params: normal(std=0.02) weights, zero bias
    # (matches functools.partial(nn.init.normal_, std=0.02) + parallel-linear zero bias)
    t = jax.random.uniform(k_t, (N,), dtype=jnp.float32) * 1000.0
    w1 = 0.02 * jax.random.normal(k_w1, (HIDDEN, FREQ), dtype=jnp.float32)
    b1 = jnp.zeros((HIDDEN,), jnp.float32)
    w2 = 0.02 * jax.random.normal(k_w2, (HIDDEN, HIDDEN), dtype=jnp.float32)
    b2 = jnp.zeros((HIDDEN,), jnp.float32)

    params = prepare_timestep_embedder_params(w1, b1, w2, b2)   # one-time cast, not per call
    out = parallel_timestep_embedder(t, params, frequency_embedding_size=FREQ)
    out = jax.block_until_ready(out)

    ref = _reference(t, w1, b1, w2, b2, frequency_embedding_size=FREQ)
    assert out.shape == (N, HIDDEN)
    # Tolerance accounts for bf16 weights/activations in the matmuls (f32 accumulation);
    # the bf16 cast of the cos/sin embedding is the dominant error source.
    assert jnp.allclose(out, ref, atol=2e-3, rtol=1e-2), "mismatch vs pure-JAX reference"

    print("KERNEL_OK")
</pallas_src>

<mosaic_0001>
module attributes {stable_mosaic.version = 11 : i64} {
  func.func @_timestep_mlp_kernel(%arg0: i32, %arg1: memref<8x1xf32, #tpu.memory_space<vmem>>, %arg2: memref<128x256xbf16, #tpu.memory_space<vmem>>, %arg3: memref<128x128xbf16, #tpu.memory_space<vmem>>, %arg4: memref<2x128xf32, #tpu.memory_space<vmem>>, %arg5: memref<8x128xf32, #tpu.memory_space<vmem>>) attributes {dimension_semantics = [#tpu.dimension_semantics<parallel>], iteration_bounds = array<i64: 1>, scalar_prefetch = 0 : i64, scratch_operands = 0 : i64, tpu.core_type = #tpu.core_type<tc>, window_params = [{transform_indices = @transform_0, window_bounds = array<i64: 8, 1>}, {pipeline_mode = #tpu.pipeline_mode<synchronous>, transform_indices = @transform_1, window_bounds = array<i64: 128, 256>}, {pipeline_mode = #tpu.pipeline_mode<synchronous>, transform_indices = @transform_2, window_bounds = array<i64: 128, 128>}, {pipeline_mode = #tpu.pipeline_mode<synchronous>, transform_indices = @transform_3, window_bounds = array<i64: 2, 128>}, {transform_indices = @transform_4, window_bounds = array<i64: 8, 128>}]} {
    %0 = tpu.iota {dimensions = array<i32: 1>} : vector<1x256xi32>
    %c128_i32 = arith.constant 128 : i32
    %1 = vector.broadcast %c128_i32 : i32 to vector<1x256xi32>
    %2 = arith.cmpi slt, %0, %1 : vector<1x256xi32>
    %c128_i32_0 = arith.constant 128 : i32
    %3 = vector.broadcast %c128_i32_0 : i32 to vector<1x256xi32>
    %4 = arith.subi %0, %3 : vector<1x256xi32>
    %5 = arith.select %2, %0, %4 : vector<1x256xi1>, vector<1x256xi32>
    %6 = arith.sitofp %5 : vector<1x256xi32> to vector<1x256xf32>
    %cst = arith.constant -0.0719557852 : f32
    %7 = vector.broadcast %cst : f32 to vector<1x256xf32>
    %8 = arith.mulf %6, %7 : vector<1x256xf32>
    %9 = math.exp %8 : vector<1x256xf32>
    %c0 = arith.constant 0 : index
    %c0_1 = arith.constant 0 : index
    %10 = vector.load %arg1[%c0, %c0_1] : memref<8x1xf32, #tpu.memory_space<vmem>>, vector<8x1xf32>
    %11 = vector.broadcast %10 : vector<8x1xf32> to vector<8x256xf32>
    %12 = vector.broadcast %9 : vector<1x256xf32> to vector<8x256xf32>
    %13 = arith.mulf %11, %12 : vector<8x256xf32>
    %14 = math.cos %13 : vector<8x256xf32>
    %15 = math.sin %13 : vector<8x256xf32>
    %16 = vector.shape_cast %2 : vector<1x256xi1> to vector<1x256xi1>
    %17 = vector.broadcast %16 : vector<1x256xi1> to vector<8x256xi1>
    %18 = arith.select %17, %14, %15 : vector<8x256xi1>, vector<8x256xf32>
    %19 = arith.truncf %18 : vector<8x256xf32> to vector<8x256xbf16>
    %c0_2 = arith.constant 0 : index
    %c0_3 = arith.constant 0 : index
    %20 = vector.load %arg2[%c0_2, %c0_3] : memref<128x256xbf16, #tpu.memory_space<vmem>>, vector<128x256xbf16>
    %cst_4 = arith.constant dense<0.000000e+00> : vector<8x128xf32>
    %21 = tpu.matmul %19, %20, %cst_4 {dimension_numbers = #tpu.dot_dimension_numbers<[1], [1], [0], [0], [0, 0, 1, 0], [], []>} : vector<8x256xbf16>, vector<128x256xbf16>, vector<8x128xf32> -> vector<8x128xf32>
    %c0_5 = arith.constant 0 : index
    %c0_6 = arith.constant 0 : index
    %22 = vector.load %arg4[%c0_5, %c0_6] : memref<2x128xf32, #tpu.memory_space<vmem>>, vector<1x128xf32>
    %23 = vector.broadcast %22 : vector<1x128xf32> to vector<8x128xf32>
    %24 = arith.addf %21, %23 : vector<8x128xf32>
    %cst_7 = arith.constant 0.000000e+00 : f32
    %25 = vector.broadcast %cst_7 : f32 to vector<8x128xf32>
    %26 = arith.subf %25, %24 : vector<8x128xf32>
    %27 = math.exp %26 : vector<8x128xf32>
    %cst_8 = arith.constant 1.000000e+00 : f32
    %28 = vector.broadcast %cst_8 : f32 to vector<8x128xf32>
    %29 = arith.addf %28, %27 : vector<8x128xf32>
    %30 = arith.divf %24, %29 : vector<8x128xf32>
    %31 = arith.truncf %30 : vector<8x128xf32> to vector<8x128xbf16>
    %c0_9 = arith.constant 0 : index
    %c0_10 = arith.constant 0 : index
    %32 = vector.load %arg3[%c0_9, %c0_10] : memref<128x128xbf16, #tpu.memory_space<vmem>>, vector<128x128xbf16>
    %cst_11 = arith.constant dense<0.000000e+00> : vector<8x128xf32>
    %33 = tpu.matmul %31, %32, %cst_11 {dimension_numbers = #tpu.dot_dimension_numbers<[1], [1], [0], [0], [0, 0, 1, 0], [], []>} : vector<8x128xbf16>, vector<128x128xbf16>, vector<8x128xf32> -> vector<8x128xf32>
    %c1 = arith.constant 1 : index
    %c0_12 = arith.constant 0 : index
    %34 = vector.load %arg4[%c1, %c0_12] : memref<2x128xf32, #tpu.memory_space<vmem>>, vector<1x128xf32>
    %35 = vector.broadcast %34 : vector<1x128xf32> to vector<8x128xf32>
    %36 = arith.addf %33, %35 : vector<8x128xf32>
    %c0_13 = arith.constant 0 : index
    %c0_14 = arith.constant 0 : index
    %37 = vector.load %arg5[%c0_13, %c0_14] : memref<8x128xf32, #tpu.memory_space<vmem>>, vector<8x128xf32>
    tpu.vector_store %arg5[%c0_13, %c0_14], %36 {strides = array<i32>} : memref<8x128xf32, #tpu.memory_space<vmem>>, vector<8x128xf32>,
    return
  }
  func.func @transform_0(%arg0: i32) -> (i32, i32) {
    %c0_i32 = arith.constant 0 : i32
    %c0_i32_0 = arith.constant 0 : i32
    return %arg0, %c0_i32 : i32, i32
  }
  func.func @transform_1(%arg0: i32) -> (i32, i32) {
    %c0_i32 = arith.constant 0 : i32
    %c0_i32_0 = arith.constant 0 : i32
    %c0_i32_1 = arith.constant 0 : i32
    return %c0_i32, %c0_i32_0 : i32, i32
  }
  func.func @transform_2(%arg0: i32) -> (i32, i32) {
    %c0_i32 = arith.constant 0 : i32
    %c0_i32_0 = arith.constant 0 : i32
    %c0_i32_1 = arith.constant 0 : i32
    return %c0_i32, %c0_i32_0 : i32, i32
  }
  func.func @transform_3(%arg0: i32) -> (i32, i32) {
    %c0_i32 = arith.constant 0 : i32
    %c0_i32_0 = arith.constant 0 : i32
    %c0_i32_1 = arith.constant 0 : i32
    return %c0_i32, %c0_i32_0 : i32, i32
  }
  func.func @transform_4(%arg0: i32) -> (i32, i32) {
    %c0_i32 = arith.constant 0 : i32
    %c0_i32_0 = arith.constant 0 : i32
    return %arg0, %c0_i32 : i32, i32
  }
}

</mosaic_0001>

<bundles_post_ra>
// kernel: tpu_custom_call.1
= control target key start
LH: loop header
LB: loop body
LE: loop exit
PB: predicated region body
PF: predicated region fallthrough
CT: control target
= control target key end

     0   :  { %9 = vsyncpa [#allocation3], 0  ;;  %s1090_s0 = inlined_call_operand.vmem [shape: f32[8,1], index: 0, kind: input, shape index: {}]   ;;  %s1091_s1 = inlined_call_operand.hbm [shape: bf16[128,256], index: 1, kind: input, shape index: {}]   ;;  %s1092_s2 = inlined_call_operand.hbm [shape: bf16[128,128], index: 2, kind: input, shape index: {}]   ;;  %s1093_s3 = inlined_call_operand.vmem [shape: f32[2,128], index: 3, kind: input, shape index: {}]   ;;  %s1094_s4 = inlined_call_operand.hbm [shape: f32[8,128], index: 4, kind: output, shape index: {}]  }
   0x1   :  { %10 = vsyncpa [#allocation6], 0 }
   0x2   :  { %11 = vsyncpa [#allocation4], 0  ;;  %s974_s15 = smov [#allocation2]   ;;  %s902_s19 = scalar_lea.hbm %s1091_s1, 2048 }
   0x3   :  { %s19_s16 = sshll.u32 %s974_s15, 4  ;;  %p903_p0 = scmp.ne.s32.totalorder %s1091_s1, %s902_s19  ;;  %s20_s16 = int_to_ptr.vmem [resolvable:$true] %s19_s16 }
   0x4   :  { %p906_p1 = scmp.lt.u32.totalorder %s902_s19, %s1091_s1 }
   0x6   :  { %p908_p2 = pnand %p906_p1, %p903_p0 }
   0x8   :  { %911 = shalt.err (!%p908_p2)
}
   0x9   :  { %s912_s24 = scalar_lea.vmem %s20_s16, 2048  ;;  %p917_p4 = scmp.lt.s32.totalorder %s20_s16, %s20_s16 }
   0xa   :  { %p913_p3 = scmp.ne.s32.totalorder %s20_s16, %s912_s24  ;;  %p918_p5 = scmp.lt.s32.totalorder %s912_s24, %s912_s24 }
   0xc   :  { %p919_p6 = por %p918_p5, %p917_p4 }
   0xe   :  { %p920_p7 = pnand %p919_p6, %p913_p3 }
  0x10   :  { %923 = shalt.err (!%p920_p7)
}
  0x11   :  { %s975_s25 = smov 128   ;;  %s976_s26 = smov 8  }
  0x12   :  { %25 = dma.hbm_to_vmem [thread:$0]  %s1091_s1, 2048, %s20_s16, [#allocation3], %s975_s25, %s975_s25, %s976_s26  }
  0x13   :  { %s977_s29 = smov [#allocation5]   ;;  %s924_s7 = scalar_lea.hbm %s1092_s2, 1024 }
  0x14   :  { %s31_s30 = sshll.u32 %s977_s29, 4  ;;  %p925_p8 = scmp.ne.s32.totalorder %s1092_s2, %s924_s7  ;;  %s32_s30 = int_to_ptr.vmem [resolvable:$true] %s31_s30 }
  0x15   :  { %p928_p9 = scmp.lt.u32.totalorder %s924_s7, %s1092_s2 }
  0x17   :  { %p930_p10 = pnand %p928_p9, %p925_p8 }
  0x19   :  { %933 = shalt.err (!%p930_p10)
}
  0x1a   :  { %s934_s12 = scalar_lea.vmem %s32_s30, 1024  ;;  %p939_p12 = scmp.lt.s32.totalorder %s32_s30, %s32_s30 }
  0x1b   :  { %p935_p11 = scmp.ne.s32.totalorder %s32_s30, %s934_s12  ;;  %p940_p13 = scmp.lt.s32.totalorder %s934_s12, %s934_s12 }
  0x1d   :  { %p941_p0 = por %p940_p13, %p939_p12 }
  0x1f   :  { %p942_p1 = pnand %p941_p0, %p935_p11 }
  0x21   :  { %945 = shalt.err (!%p942_p1)
}
  0x22   :  { %s978_s1 = smov 64   ;;  %s979_s13 = smov 4  }
  0x23   :  { %37 = dma.hbm_to_vmem [thread:$0]  %s1092_s2, 1024, %s32_s30, [#allocation6], %s978_s1, %s978_s1, %s979_s13  }
  0x24   :  { %968 = dma.done.wait [#allocation3], 2048  }
  0x25   :  { %969 = vsyncadd [#allocation3], 4294965248 }
  0x26   :  { %970 = dma.done.wait [#allocation6], 1024  }
  0x27   :  { %971 = vsyncadd [#allocation6], 4294966272  ;;  %v980_v0 = vmov 0   ;;  %v63_v1 = vld [vmem:[%s1090_s0] sm:$0xff]  ;;  %v860_v2 = vld [vmem:[#allocation2 + $0x4] ss:$8 sps:$4 sm:$0xff]   ;;  %v47_v21 = vlaneseq }
  0x28   :  { %859 = vset.pattern.permute.xlu0 %v980_v0  ;;  %v862_v3 = vld [vmem:[#allocation2] ss:$8 sps:$4 sm:$0xff]   ;;  %v863_v4 = vld [vmem:[#allocation2 + $0x14] ss:$8 sps:$4 sm:$0xff]   ;;  %594 = vmatprep.subr.bf16.mxu0 %v860_v2  ;;  %v865_v5 = vld [vmem:[#allocation2 + $0x10] ss:$8 sps:$4 sm:$0xff]  }
  0x29   :  { %66 = vperm.xlu0 %859, %v63_v1   ;;  %595 = vmatpush1.bf16.xpose.msra.mxu0 %v862_v3  ;;  %v866_v6 = vld [vmem:[#allocation2 + $0x24] ss:$8 sps:$4 sm:$0xff]   ;;  %v868_v7 = vld [vmem:[#allocation2 + $0x20] ss:$8 sps:$4 sm:$0xff]   ;;  %v869_v8 = vld [vmem:[#allocation2 + $0x34] ss:$8 sps:$4 sm:$0xff]  }
  0x2a   :  { %596 = vmatprep.subr.bf16.mxu0 %v863_v4  ;;  %v871_v9 = vld [vmem:[#allocation2 + $0x30] ss:$8 sps:$4 sm:$0xff]   ;;  %v872_v10 = vld [vmem:[#allocation2 + $0x44] ss:$8 sps:$4 sm:$0xff]   ;;  %v874_v11 = vld [vmem:[#allocation2 + $0x40] ss:$8 sps:$4 sm:$0xff]  }
  0x2b   :  { %v875_v12 = vld [vmem:[#allocation2 + $0x54] ss:$8 sps:$4 sm:$0xff]   ;;  %v877_v13 = vld [vmem:[#allocation2 + $0x50] ss:$8 sps:$4 sm:$0xff]   ;;  %v878_v14 = vld [vmem:[#allocation2 + $0x64] ss:$8 sps:$4 sm:$0xff]  }
  0x2c   :  { %v880_v15 = vld [vmem:[#allocation2 + $0x60] ss:$8 sps:$4 sm:$0xff]   ;;  %v881_v16 = vld [vmem:[#allocation2 + $0x74] ss:$8 sps:$4 sm:$0xff]   ;;  %v883_v17 = vld [vmem:[#allocation2 + $0x70] ss:$8 sps:$4 sm:$0xff]  }
  0x2d   :  { %v884_v18 = vld [vmem:[#allocation5] sm:$0xff]   ;;  %v981_v19 = vmov 0.0   ;;  %v885_v20 = vld [vmem:[#allocation5 + $0x8] sm:$0xff]   ;;  %v48_v22 = vand.u32 127, %v47_v21  ;;  %v886_v23 = vld [vmem:[#allocation5 + $0x10] sm:$0xff]   ;;  %s989_s20 = smov [#allocation7]  }
  0x2e   :  { %819 = vmatprep.subr.bf16.mxu1 %v981_v19  ;;  %v887_v26 = vld [vmem:[#allocation5 + $0x18] sm:$0xff]   ;;  %v982_v42 = vmov 2102212464   ;;  %v983_v44 = vmov 920167782   ;;  %s757_s21 = sshll.u32 %s989_s20, 4  ;;  %s758_s21 = int_to_ptr.vmem [resolvable:$true] %s757_s21 }
  0x2f   :  { %820 = vmatpush3.bf16.xpose.msra.mxu1 %v884_v18  ;;  %v55_v24 = vcvt.s32.f32 %v48_v22  ;;  %v984_v48 = vmov 1326507024   ;;  %v985_v50 = vmov 683565275   ;;  %v986_v52 = vmov 2475754826   ;;  %p951_p3 = scmp.lt.s32.totalorder %s758_s21, %s758_s21 }
  0x30   :  { %821 = vmatprep.subr.bf16.mxu1 %v981_v19  ;;  %v987_v55 = vmov 2131351028   ;;  %s946_s22 = scalar_lea.vmem %s758_s21, 128 }
  0x31   :  { %597 = vmatpush1.bf16.xpose.msra.mxu0 %v865_v5  ;;  %v57_v25 = vmul.f32 -0.071955785, %v55_v24  ;;  %p947_p2 = scmp.ne.s32.totalorder %s758_s21, %s946_s22  ;;  %p952_p4 = scmp.lt.s32.totalorder %s946_s22, %s946_s22 }
  0x32   :  { %598 = vmatprep.subr.bf16.mxu0 %v866_v6 }
  0x33   :  { %v59_v27 = vmul.f32 1.442695, %v57_v25  ;;  %p953_p5 = por %p952_p4, %p951_p3 }
  0x35   :  { %892 = vpow2.f32 %v59_v27  ;;  %p954_p6 = pnand %p953_p5, %p947_p2 }
  0x37   :  { %822 = vmatpush3.bf16.xpose.msra.mxu1 %v885_v20 }
  0x38   :  { %823 = vmatprep.subr.bf16.mxu1 %v981_v19 }
  0x39   :  { %599 = vmatpush1.bf16.xpose.msra.mxu0 %v868_v7 }
  0x3a   :  { %600 = vmatprep.subr.bf16.mxu0 %v869_v8 }
  0x3f   :  { %824 = vmatpush3.bf16.xpose.msra.mxu1 %v886_v23  ;;  %v893_v28 = vpop.eup %892 }
  0x40   :  { %825 = vmatprep.subr.bf16.mxu1 %v981_v19 }
  0x41   :  { %601 = vmatpush1.bf16.xpose.msra.mxu0 %v871_v9 }
  0x42   :  { %602 = vmatprep.subr.bf16.mxu0 %v872_v10 }
  0x47   :  { %826 = vmatpush3.bf16.xpose.msra.mxu1 %v887_v26 }
  0x48   :  { %827 = vmatprep.subr.bf16.mxu1 %v981_v19 }
  0x49   :  { %603 = vmatpush1.bf16.xpose.msra.mxu0 %v874_v11 }
  0x4a   :  { %604 = vmatprep.subr.bf16.mxu0 %v875_v12 }
  0x51   :  { %605 = vmatpush1.bf16.xpose.msra.mxu0 %v877_v13 }
  0x52   :  { %606 = vmatprep.subr.bf16.mxu0 %v878_v14 }
  0x59   :  { %607 = vmatpush1.bf16.xpose.msra.mxu0 %v880_v15 }
  0x5a   :  { %608 = vmatprep.subr.bf16.mxu0 %v881_v16 }
  0x61   :  { %609 = vmatpush1.bf16.xpose.msra.mxu0 %v883_v17 }
  0xa8   :  { %v67_v29 = vpop.permute.xlu0 %66 }
  0xa9   :  { %v1047_v30 = vmul.f32 %v893_v28, %v67_v29 }
  0xab   :  { %v74_v31 = vand.u32 2139095040, %v1047_v30  ;;  %v71_v32 = vand.u32 2147483647, %v1047_v30  ;;  %vm73_vm7 = vcmp.lt.s32.totalorder %v1047_v30, 0  ;;  %vm163_vm15 = vweird.f32 %v1047_v30 }
  0xad   :  { %v75_v33 = vshrl.u32 %v74_v31, 23  ;;  %v78_v35 = vand.u32 8388607, %v71_v32  ;;  %vm72_vm8 = vcmp.le.f32.partialorder %v71_v32, 0.7853982 }
  0xaf   :  { %v768_v34 = vadd.s32 4294967169, %v75_v33  ;;  %v79_v38 = vor.u32 8388608, %v78_v35 }
  0xb1   :  { %v81_v36 = vadd.s32 1, %v768_v34  ;;  %v119_v46 = vshll.u32 %v79_v38, 8 }
  0xb3   :  { %vm82_vm0 = vcmp.gt.s32.totalorder %v81_v36, 0 }
  0xb4   :  { %v83_v37 = vsel %vm82_vm0, %v81_v36, 0  ;;  %vm988_vm0 = vmmov 0  }
  0xb5   :  { %v85_v39 = vand.u32 31, %v83_v37  ;;  %v84_v40 = vshrl.u32 %v83_v37, 5  ;;  %835 = vmatprep.mubr.msk.bf16.mxu1 %vm988_vm0, %v981_v19 }
  0xb7   :  { %v86_v41 = vsub.s32 32, %v85_v39  ;;  %v97_v43 = vshll.u32 %v982_v42, %v85_v39  ;;  %v100_v45 = vshll.u32 %v983_v44, %v85_v39  ;;  %v88_v51 = vshll.u32 %v985_v50, %v85_v39 }
  0xb8   :  { %v91_v54 = vshll.u32 %v986_v52, %v85_v39  ;;  %v94_v57 = vshll.u32 %v987_v55, %v85_v39  ;;  %vm106_vm1 = vcmp.lt.s32.totalorder %v84_v40, 4  ;;  %vm103_vm2 = vcmp.lt.s32.totalorder %v84_v40, 1 }
  0xb9   :  { %v98_v47 = vshrl.u32 %v983_v44, %v86_v41  ;;  %v101_v49 = vshrl.u32 %v984_v48, %v86_v41  ;;  %v89_v53 = vshrl.u32 %v986_v52, %v86_v41  ;;  %v92_v56 = vshrl.u32 %v987_v55, %v86_v41 }
  0xba   :  { %v95_v58 = vshrl.u32 %v982_v42, %v86_v41  ;;  %v87_v62 = vshrl.u32 %v985_v50, %v86_v41  ;;  %vm104_vm3 = vcmp.lt.s32.totalorder %v84_v40, 2  ;;  %vm105_vm4 = vcmp.lt.s32.totalorder %v84_v40, 3 }
  0xbb   :  { %v99_v59 = vor.u32 %v98_v47, %v97_v43  ;;  %v102_v60 = vor.u32 %v101_v49, %v100_v45  ;;  %v90_v61 = vor.u32 %v89_v53, %v88_v51  ;;  %v93_v63 = vor.u32 %v92_v56, %v91_v54 }
  0xbc   :  { %v96_v0 = vor.u32 %v95_v58, %v94_v57 }
  0xbd   :  { %v112_v1 = vsel %vm106_vm1, %v99_v59, 920167782  ;;  %v116_v2 = vsel %vm106_vm1, %v102_v60, 1326507024  ;;  %v111_v4 = vsel %vm103_vm2, %v90_v61, %v93_v63  ;;  %v107_v7 = vsel %vm103_vm2, %v87_v62, %v90_v61 }
  0xbe   :  { %v108_v3 = vsel %vm106_vm1, %v96_v0, 2102212464  ;;  %v113_v5 = vsel %vm105_vm4, %v96_v0, %v112_v1  ;;  %v115_v6 = vsel %vm103_vm2, %v93_v63, %v96_v0  ;;  %v117_v10 = vsel %vm105_vm4, %v99_v59, %v116_v2 }
  0xbf   :  { %v109_v8 = vsel %vm105_vm4, %v93_v63, %v108_v3  ;;  %v114_v9 = vsel %vm104_vm3, %v111_v4, %v113_v5  ;;  %v118_v11 = vsel %vm104_vm3, %v115_v6, %v117_v10  ;;  %v888_v3 = vld [vmem:[#allocation5 + $0x20] sm:$0xff]   ;;  %v889_v4 = vld [vmem:[#allocation5 + $0x28] sm:$0xff]   ;;  %v890_v5 = vld [vmem:[#allocation5 + $0x30] sm:$0xff]  }
  0xc0   :  { %v1053_v12 = vmul.u32.u64.low %v119_v46, %v114_v9  ;;  %v1054_v13 = vmul.u32.u64.high %v119_v46, %v114_v9, %v1053_v12  ;;  %v1056_v14 = vmul.u32.u64.low %v119_v46, %v118_v11  ;;  %v1057_v15 = vmul.u32.u64.high %v119_v46, %v118_v11, %v1056_v14  ;;  %828 = vmatpush3.bf16.xpose.msra.mxu1 %v888_v3  ;;  %v784_v6 = vld [vmem:[%s1093_s3] ss:$0 sm:$0xff] }
  0xc1   :  { %v110_v16 = vsel %vm104_vm3, %v107_v7, %v109_v8  ;;  %829 = vmatprep.subr.bf16.mxu1 %v981_v19 }
  0xc2   :  { %v129_v17 = vadd.s32 1, %v1054_v13  ;;  %v126_v18 = vmul.u32 %v119_v46, %v110_v16  ;;  %vm128_vm5 = vc.u32 %v1057_v15, %v1053_v12  ;;  %v127_v33 = vadd.s32 %v1053_v12, %v1057_v15 }
  0xc4   :  { %v130_v20 = vsel %vm128_vm5, %v129_v17, %v1054_v13 }
  0xc5   :  { %v131_v21 = vadd.s32 %v130_v20, %v126_v18 }
  0xc7   :  { %v132_v22 = vadd.s32 536870912, %v131_v21 }
  0xc8   :  { %830 = vmatpush3.bf16.xpose.msra.mxu1 %v889_v4 }
  0xc9   :  { %v133_v23 = vshrl.u32 %v132_v22, 30  ;;  %831 = vmatprep.subr.bf16.mxu1 %v981_v19 }
  0xcb   :  { %v134_v24 = vshll.u32 %v133_v23, 30  ;;  %v157_v45 = vsub.s32 4, %v133_v23 }
  0xcd   :  { %v135_v25 = vsub.s32 %v131_v21, %v134_v24  ;;  %v158_v48 = vsel %vm73_vm7, %v157_v45, %v133_v23 }
  0xce   :  { %v160_v50 = vsel %vm72_vm8, 0, %v158_v48 }
  0xcf   :  { %v137_v26 = vsub.s32 0, %v135_v25  ;;  %v474_v51 = vadd.s32 3, %v160_v50  ;;  %v164_v52 = vand.u32 3, %v160_v50 }
  0xd0   :  { %832 = vmatpush3.bf16.xpose.msra.mxu1 %v890_v5 }
  0xd1   :  { %v769_v27 = vmin.u32 %v137_v26, %v135_v25  ;;  %v475_v53 = vand.u32 3, %v474_v51  ;;  %vm169_vm9 = vcmp.eq.s32.totalorder %v164_v52, 2  ;;  %vm166_vm11 = vcmp.eq.s32.totalorder %v164_v52, 0  ;;  %833 = vmatprep.subr.bf16.mxu1 %v981_v19  ;;  %v801_v19 = vld [vmem:[%s1093_s3 + $0x1] ss:$0 sm:$0xff] }
  0xd2   :  { %vm165_vm13 = vcmp.lt.s32.totalorder %v164_v52, 2 }
  0xd3   :  { %v139_v28 = vclz %v769_v27  ;;  %vm480_vm10 = vcmp.eq.s32.totalorder %v475_v53, 2  ;;  %vm477_vm12 = vcmp.eq.s32.totalorder %v475_v53, 0  ;;  %vm476_vm14 = vcmp.lt.s32.totalorder %v475_v53, 2 }
  0xd5   :  { %v770_v29 = vadd.s32 4294967294, %v139_v28 }
  0xd7   :  { %vm771_vm6 = vcmp.lt.s32.totalorder %v770_v29, 0 }
  0xd8   :  { %v142_v31 = vsel %vm771_vm6, 0, %v770_v29 }
  0xd9   :  { %v143_v34 = vsub.s32 32, %v142_v31  ;;  %v147_v35 = vsub.s32 4294967266, %v142_v31  ;;  %v144_v36 = vshll.u32 %v135_v25, %v142_v31 }
  0xdb   :  { %v145_v37 = vshrl.u32 %v127_v33, %v143_v34  ;;  %v148_v38 = vadd.s32 127, %v147_v35 }
  0xdd   :  { %v146_v39 = vor.u32 %v145_v37, %v144_v36  ;;  %v149_v40 = vshll.u32 %v148_v38, 23 }
  0xdf   :  { %v150_v41 = vor.u32 4788187, %v149_v40  ;;  %v153_v43 = vcvt.s32.f32 %v146_v39 }
  0xe1   :  { %v151_v42 = vand.u32 2147483647, %v150_v41 }
  0xe3   :  { %v154_v44 = vmul.f32 %v153_v43, %v151_v42 }
  0xe5   :  { %v155_v46 = vxor.u32 2147483648, %v154_v44 }
  0xe7   :  { %v156_v47 = vsel %vm73_vm7, %v155_v46, %v154_v44 }
  0xe8   :  { %v159_v49 = vsel %vm72_vm8, %v1047_v30, %v156_v47  ;;  %v891_v30 = vld [vmem:[#allocation5 + $0x38] sm:$0xff]  }
  0xe9   :  { %894 = vcosq.f32 %v159_v49  ;;  %834 = vmatpush3.bf16.xpose.msra.mxu1 %v891_v30 }
  0xea   :  { %896 = vsinq.f32 %v159_v49 }
  0xf3   :  { %v895_v54 = vpop.eup %894 }
  0xf4   :  { %v897_v55 = vpop.eup %896  ;;  %v170_v56 = vxor.u32 2147483648, %v895_v54 }
  0xf5   :  { %v167_v57 = vxor.u32 2147483648, %v897_v55 }
  0xf6   :  { %v171_v58 = vsel %vm169_vm9, %v170_v56, %v897_v55  ;;  %v482_v32 = vsel %vm480_vm10, %v170_v56, %v897_v55 }
  0xf7   :  { %v168_v59 = vsel %vm166_vm11, %v895_v54, %v167_v57  ;;  %v479_v60 = vsel %vm477_vm12, %v895_v54, %v167_v57 }
  0xf8   :  { %v172_v61 = vsel %vm165_vm13, %v168_v59, %v171_v58  ;;  %v483_v62 = vsel %vm476_vm14, %v479_v60, %v482_v32 }
  0xf9   :  { %v173_v63 = vsel %vm163_vm15, nan, %v172_v61  ;;  %v484_v0 = vsel %vm163_vm15, nan, %v483_v62 }
  0xfa   :  { %v491_v1 = vpack.c.bf16 %v173_v63, %v173_v63  ;;  %v492_v2 = vpack.c.bf16 %v484_v0, %v484_v0 }
  0xfc   :  { %626 = vmatprep.mubr.bf16.mxu0 %v492_v2 }
  0xfd   :  { %627 = vmatmul.mubr.bf16.vlgmr.msra.gmra.mrb[0].mxu0 %v491_v1 }
 0x1d0   :  { %v628_v7 = vpop.f32.mrb[0].mxu0 }
 0x1d1   :  { %v629_v8 = vadd.f32 %v784_v6, %v628_v7  ;;  %v630_v9 = vpop.f32.mrb[1].mxu0 }
 0x1d2   :  { %v631_v10 = vpop.f32.mrb[2].mxu0 }
 0x1d3   :  { %v634_v11 = vsub.f32 0.0, %v629_v8  ;;  %v632_v12 = vpop.f32.mrb[3].mxu0 }
 0x1d5   :  { %v635_v13 = vmul.f32 1.442695, %v634_v11 }
 0x1d7   :  { %898 = vpow2.f32 %v635_v13 }
 0x1e1   :  { %v899_v14 = vpop.eup %898 }
 0x1e2   :  { %v637_v15 = vadd.f32 1.0, %v899_v14 }
 0x1e4   :  { %900 = vrcp.f32 %v637_v15 }
 0x1ee   :  { %v901_v16 = vpop.eup %900 }
 0x1ef   :  { %v639_v17 = vmul.f32 %v901_v16, %v629_v8 }
 0x1f1   :  { %v640_v18 = vpack.c.bf16 %v639_v17, %v639_v17 }
 0x1f3   :  { %836 = vmatmul.mubr.bf16.vlgmr.msra.gmra.mrb[0].mxu1 %v640_v18 }
 0x2c6   :  { %v744_v20 = vpop.f32.mrb[0].mxu1 }
 0x2c7   :  { %v745_v21 = vadd.f32 %v801_v19, %v744_v20  ;;  %v837_v22 = vpop.f32.mrb[1].mxu1 }
 0x2c8   :  { %v747_v23 = vpop.f32.mrb[2].mxu1 }
 0x2c9   :  { %750 = vst [vmem:[#allocation7] sm:$0xff] %v745_v21  ;;  %v838_v24 = vpop.f32.mrb[3].mxu1 }
 0x2ca   :  { %957 = shalt.err (!%p954_p6)
}
 0x2cb   :  { %s958_s3 = scalar_lea.hbm %s1094_s4, 128 }
 0x2cc   :  { %p959_p7 = scmp.ne.s32.totalorder %s1094_s4, %s958_s3  ;;  %p962_p8 = scmp.lt.u32.totalorder %s958_s3, %s1094_s4 }
 0x2ce   :  { %p964_p9 = pnand %p962_p8, %p959_p7 }
 0x2d0   :  { %967 = shalt.err (!%p964_p9)
}
 0x2d1   :  { %760 = dma.vmem_to_hbm [thread:$0]  %s758_s21, 128, %s1094_s4, [#allocation4]  }
 0x2d2   :  { %972 = dma.done.wait [#allocation4], 128  }
 0x2d3   :  { %973 = vsyncadd [#allocation4], 4294967168 }
 0x2d4   :  { %764 = vsyncpa [#allocation3], 1 }
 0x2d5   :  { %765 = vsyncpa [#allocation6], 1 }
 0x2d6   :  { %766 = vsyncpa [#allocation4], 1 }

</bundles_post_ra>
